<compile_context>
chip_gen: v7x
topology: tpu7x:2x2x1
jax: 0.10.0
libtpu: 0.0.40
codegen_flags: <defaults>
</compile_context>

<pallas_src>
import jax
import jax.numpy as jnp
from jax import lax
from jax.experimental import pallas as pl
from jax.experimental.pallas import tpu as pltpu


def _round_up(v, m):
    return ((v + m - 1) // m) * m


def _make_kernel(C, G, H, W, NB, KP):
    HW = H * W
    SLAB = NB * HW
    Cg = C // G
    EPS = 1e-5                      # PyTorch GroupNorm default eps
    INV_CNT = 1.0 / float(Cg * HW)  # per-(sample, group) element count
    NTAP = 9 * C

    def gn_coeffs(chunk, gamma, beta):
        # chunk: (C, HW) one sample; gamma/beta: (C, 1). Returns per-channel a, b
        # with normalized = chunk * a + b  (a = inv*gamma, b = beta - mu*a).
        s1 = jnp.sum(chunk, axis=-1, keepdims=True)          # (C, 1)
        s2 = jnp.sum(chunk * chunk, axis=-1, keepdims=True)  # (C, 1)
        if Cg == 1:
            gs1, gs2 = s1, s2
        else:
            gs1 = jnp.sum(s1.reshape(G, Cg), axis=-1, keepdims=True)
            gs2 = jnp.sum(s2.reshape(G, Cg), axis=-1, keepdims=True)
        mu = gs1 * INV_CNT
        var = jnp.maximum(gs2 * INV_CNT - mu * mu, 0.0)      # clamp one-pass var
        inv = lax.rsqrt(var + EPS)
        if Cg > 1:
            mu = jnp.broadcast_to(mu.reshape(G, 1, 1), (G, Cg, 1)).reshape(C, 1)
            inv = jnp.broadcast_to(inv.reshape(G, 1, 1), (G, Cg, 1)).reshape(C, 1)
        a = inv * gamma
        b = beta - mu * a
        return a, b

    def group_norm(h, gamma, beta, relu):
        # h: (C, SLAB). Per-sample stats via static, lane-aligned slices (NB <= 4).
        outs = []
        for s in range(NB):
            chunk = h[:, s * HW:(s + 1) * HW] if NB > 1 else h
            a, b = gn_coeffs(chunk, gamma, beta)
            r = chunk * a + b
            if relu:
                r = jnp.maximum(r, 0.0)
            outs.append(r)
        return outs[0] if NB == 1 else jnp.concatenate(outs, axis=1)

    def kernel(x_ref, mask_ref, ext_ref,
               g1_ref, b1_ref, w1_ref,
               g2_ref, b2_ref, w2_ref,
               g3_ref, b3_ref,
               o_ref, patches_ref):
        # Constant bias-fold rows (9 raw boundary-mask rows, ones row, zero pad).
        # Written every step (tiny) so the kernel stays correct when the
        # "parallel" batch axis is sharded across TensorCores (per-core scratch).
        patches_ref[NTAP:, :] = ext_ref[...]

        def conv(h, w_ext):
            # h: (C, SLAB). Build im2col patches directly in VMEM scratch:
            # one roll + one fused masked store per tap, shared by all NB samples.
            k = 0
            for dh in (-1, 0, 1):          # dh = kh - 1
                for dw in (-1, 0, 1):      # dw = kw - 1
                    s = dh * W + dw
                    # rolled[:, q] = h[:, (q + s) % SLAB]
                    rolled = pltpu.roll(h, (-s) % SLAB, 1) if s != 0 else h
                    if dh == 0 and dw == 0:
                        patches_ref[k * C:(k + 1) * C, :] = rolled   # center: valid
                    else:
                        # Pre-broadcast mask slice -> no broadcast op; roll's
                        # cross-sample / cross-row wraparound lands only where
                        # the zero-padding mask is 0.
                        patches_ref[k * C:(k + 1) * C, :] = (
                            rolled * mask_ref[k * C:(k + 1) * C, :])
                    k += 1
            # Single MXU matmul per conv; the constant-t channel and the conv
            # bias are folded into the extra K rows / weight columns.
            return jnp.dot(w_ext, patches_ref[...],
                           preferred_element_type=jnp.float32)

        h = x_ref[...]                                       # (C, SLAB)
        h = group_norm(h, g1_ref[...], b1_ref[...], relu=True)
        h = conv(h, w1_ref[...])
        h = group_norm(h, g2_ref[...], b2_ref[...], relu=True)
        h = conv(h, w2_ref[...])
        h = group_norm(h, g3_ref[...], b3_ref[...], relu=False)
        o_ref[...] = h.astype(o_ref.dtype)

    return kernel


def _boundary_masks(H, W):
    HW = H * W
    hh = jnp.arange(HW, dtype=jnp.int32) // W
    ww = jnp.arange(HW, dtype=jnp.int32) % W
    rows = []
    for dh in (-1, 0, 1):
        for dw in (-1, 0, 1):
            valid = ((hh + dh >= 0) & (hh + dh < H) &
                     (ww + dw >= 0) & (ww + dw < W))
            rows.append(valid.astype(jnp.float32))
    return jnp.stack(rows, axis=0)          # (9, HW), row k = (dh+1)*3 + (dw+1)


def odefunc_forward(t, x, params):
    """Pallas ODEfunc forward. x: (N, C, H, W) float32, t: scalar."""
    N, C, H, W = x.shape
    HW = H * W
    G = min(32, C)
    g1, b1, w1, cb1, g2, b2, w2, cb2, g3, b3 = params
    t = jnp.asarray(t, jnp.float32)

    # Samples per grid step: a divisor of N (no dead padded samples), capped at 4
    # (bounded live ranges / VMEM), and chosen so N//NB >= 2 when possible so the
    # "parallel" batch axis can feed both v7x TensorCores.
    if HW % 128 != 0:
        NB = N                      # lane blocks must be 128-aligned; single step
    else:
        NB = 1
        for cand in (4, 2):
            if N % cand == 0 and N // cand >= 2:
                NB = cand
                break
    SLAB = NB * HW
    KP = _round_up(9 * C + 10, 8)   # taps + 9 t-fold mask rows + bias row, padded
    KE = KP - 9 * C

    masks = _boundary_masks(H, W)                                  # (9, HW)
    masks_slab = jnp.tile(masks, (1, NB))                          # (9, SLAB)
    bigmask = jnp.tile(jnp.repeat(masks, C, axis=0), (1, NB))      # (9C, SLAB)
    ext_rows = [masks_slab, jnp.ones((1, SLAB), jnp.float32)]
    if KE > 10:
        ext_rows.append(jnp.zeros((KE - 10, SLAB), jnp.float32))
    extrows = jnp.concatenate(ext_rows, axis=0)                    # (KE, SLAB)

    def w_ext(w, cb):
        # x-channel taps: [cout, k*C + cin] = w[cout, 1+cin, kh, kw], k = kh*3+kw
        wx = jnp.transpose(w[:, 1:], (0, 2, 3, 1)).reshape(C, 9 * C)
        wt = t * w[:, 0].reshape(C, 9)        # t-channel taps -> mask rows
        wb = cb.reshape(C, 1)                 # conv bias -> ones row
        cols = [wx, wt, wb]
        if KE > 10:
            cols.append(jnp.zeros((C, KE - 10), jnp.float32))
        return jnp.concatenate(cols, axis=1).astype(jnp.float32)   # (C, KP)

    def col(v):
        return v.reshape(-1, 1).astype(jnp.float32)

    # (N, C, H, W) -> (C, N*HW): lane-dense slab, NB samples per grid step.
    xT = jnp.transpose(x.reshape(N, C, HW), (1, 0, 2)).reshape(C, N * HW)
    xT = xT.astype(jnp.float32)

    def full_spec(shape):
        zeros = (0,) * len(shape)
        return pl.BlockSpec(shape, lambda n, _z=zeros: _z)

    kernel = _make_kernel(C, G, H, W, NB, KP)

    outT = pl.pallas_call(
        kernel,
        out_shape=jax.ShapeDtypeStruct((C, N * HW), jnp.float32),
        grid=(N // NB,),
        in_specs=[
            pl.BlockSpec((C, SLAB), lambda n: (0, n)),   # x slab
            full_spec((9 * C, SLAB)),                    # pre-broadcast tap masks
            full_spec((KE, SLAB)),                       # bias-fold rows (masks/ones/pad)
            full_spec((C, 1)), full_spec((C, 1)), full_spec((C, KP)),   # GN1, conv1
            full_spec((C, 1)), full_spec((C, 1)), full_spec((C, KP)),   # GN2, conv2
            full_spec((C, 1)), full_spec((C, 1)),                       # GN3
        ],
        out_specs=pl.BlockSpec((C, SLAB), lambda n: (0, n)),
        scratch_shapes=[pltpu.VMEM((KP, SLAB), jnp.float32)],   # im2col patches
        compiler_params=pltpu.CompilerParams(
            dimension_semantics=("parallel",),
            vmem_limit_bytes=16 * 1024 * 1024),
    )(xT, bigmask, extrows,
      col(g1), col(b1), w_ext(w1, cb1),
      col(g2), col(b2), w_ext(w2, cb2),
      col(g3), col(b3))

    return jnp.transpose(outT.reshape(C, N, HW), (1, 0, 2)).reshape(N, C, H, W)


def odefunc_reference(t, x, params):
    """Pure-JAX reference (mirrors the PyTorch module)."""
    g1, b1, w1, cb1, g2, b2, w2, cb2, g3, b3 = params
    C = x.shape[1]
    G = min(32, C)

    def gn(h, gamma, beta):
        N, C_, H, W = h.shape
        hg = h.reshape(N, G, -1)
        mu = hg.mean(-1, keepdims=True)
        var = ((hg - mu) ** 2).mean(-1, keepdims=True)
        hn = ((hg - mu) / jnp.sqrt(var + 1e-5)).reshape(N, C_, H, W)
        return hn * gamma.reshape(1, C_, 1, 1) + beta.reshape(1, C_, 1, 1)

    def cconv(h, w, b):
        N, _, H, W = h.shape
        tt = jnp.full((N, 1, H, W), jnp.float32(t))
        z = jnp.concatenate([tt, h], axis=1)
        out = lax.conv_general_dilated(z, w, window_strides=(1, 1),
                                       padding=((1, 1), (1, 1)),
                                       dimension_numbers=("NCHW", "OIHW", "NCHW"))
        return out + b.reshape(1, -1, 1, 1)

    out = gn(x, g1, b1)
    out = jnp.maximum(out, 0.0)
    out = cconv(out, w1, cb1)
    out = gn(out, g2, b2)
    out = jnp.maximum(out, 0.0)
    out = cconv(out, w2, cb2)
    out = gn(out, g3, b3)
    return out


def init_params(key, dim):
    C = dim
    ks = jax.random.split(key, 10)
    scale = 1.0 / jnp.sqrt(9.0 * (C + 1))
    g1 = 1.0 + 0.1 * jax.random.normal(ks[0], (C,), jnp.float32)
    b1 = 0.1 * jax.random.normal(ks[1], (C,), jnp.float32)
    w1 = scale * jax.random.normal(ks[2], (C, C + 1, 3, 3), jnp.float32)
    cb1 = 0.1 * jax.random.normal(ks[3], (C,), jnp.float32)
    g2 = 1.0 + 0.1 * jax.random.normal(ks[4], (C,), jnp.float32)
    b2 = 0.1 * jax.random.normal(ks[5], (C,), jnp.float32)
    w2 = scale * jax.random.normal(ks[6], (C, C + 1, 3, 3), jnp.float32)
    cb2 = 0.1 * jax.random.normal(ks[7], (C,), jnp.float32)
    g3 = 1.0 + 0.1 * jax.random.normal(ks[8], (C,), jnp.float32)
    b3 = 0.1 * jax.random.normal(ks[9], (C,), jnp.float32)
    return (g1, b1, w1, cb1, g2, b2, w2, cb2, g3, b3)


if __name__ == "__main__":
    # TODO(synk): self.nfe (Python-side call counter) has no kernel equivalent; omitted.
    key = jax.random.PRNGKey(0)
    kx, kp = jax.random.split(key)
    N, C, H, W = 2, 8, 16, 16          # C=8 keeps sublane slices aligned; HW=256 lanes
    x = jax.random.normal(kx, (N, C, H, W), jnp.float32)
    t = 0.5
    params = init_params(kp, C)

    out = odefunc_forward(t, x, params)
    out = jax.block_until_ready(out)
    assert out.shape == (N, C, H, W) and out.dtype == jnp.float32

    ref = odefunc_reference(t, x, params)
    max_err = float(jnp.max(jnp.abs(out - ref)))
    if not max_err < 1e-3:
        raise SystemExit(f"mismatch vs reference: max abs err = {max_err}")
    print("KERNEL_OK")
</pallas_src>

<mosaic_0001>
module attributes {stable_mosaic.version = 11 : i64} {
  func.func @kernel(%arg0: i32, %arg1: memref<8x256xf32, #tpu.memory_space<vmem>>, %arg2: memref<72x256xf32, #tpu.memory_space<vmem>>, %arg3: memref<16x256xf32, #tpu.memory_space<vmem>>, %arg4: memref<8x1xf32, #tpu.memory_space<vmem>>, %arg5: memref<8x1xf32, #tpu.memory_space<vmem>>, %arg6: memref<8x88xf32, #tpu.memory_space<vmem>>, %arg7: memref<8x1xf32, #tpu.memory_space<vmem>>, %arg8: memref<8x1xf32, #tpu.memory_space<vmem>>, %arg9: memref<8x88xf32, #tpu.memory_space<vmem>>, %arg10: memref<8x1xf32, #tpu.memory_space<vmem>>, %arg11: memref<8x1xf32, #tpu.memory_space<vmem>>, %arg12: memref<8x256xf32, #tpu.memory_space<vmem>>, %arg13: memref<88x256xf32, #tpu.memory_space<vmem>>) attributes {dimension_semantics = [#tpu.dimension_semantics<parallel>], iteration_bounds = array<i64: 2>, scalar_prefetch = 0 : i64, scratch_operands = 1 : i64, tpu.core_type = #tpu.core_type<tc>, window_params = [{transform_indices = @transform_0, window_bounds = array<i64: 8, 256>}, {pipeline_mode = #tpu.pipeline_mode<synchronous>, transform_indices = @transform_1, window_bounds = array<i64: 72, 256>}, {pipeline_mode = #tpu.pipeline_mode<synchronous>, transform_indices = @transform_2, window_bounds = array<i64: 16, 256>}, {pipeline_mode = #tpu.pipeline_mode<synchronous>, transform_indices = @transform_3, window_bounds = array<i64: 8, 1>}, {pipeline_mode = #tpu.pipeline_mode<synchronous>, transform_indices = @transform_4, window_bounds = array<i64: 8, 1>}, {pipeline_mode = #tpu.pipeline_mode<synchronous>, transform_indices = @transform_5, window_bounds = array<i64: 8, 88>}, {pipeline_mode = #tpu.pipeline_mode<synchronous>, transform_indices = @transform_6, window_bounds = array<i64: 8, 1>}, {pipeline_mode = #tpu.pipeline_mode<synchronous>, transform_indices = @transform_7, window_bounds = array<i64: 8, 1>}, {pipeline_mode = #tpu.pipeline_mode<synchronous>, transform_indices = @transform_8, window_bounds = array<i64: 8, 88>}, {pipeline_mode = #tpu.pipeline_mode<synchronous>, transform_indices = @transform_9, window_bounds = array<i64: 8, 1>}, {pipeline_mode = #tpu.pipeline_mode<synchronous>, transform_indices = @transform_10, window_bounds = array<i64: 8, 1>}, {transform_indices = @transform_11, window_bounds = array<i64: 8, 256>}]} {
    %c0 = arith.constant 0 : index
    %c0_0 = arith.constant 0 : index
    %0 = vector.load %arg3[%c0, %c0_0] : memref<16x256xf32, #tpu.memory_space<vmem>>, vector<16x256xf32>
    %c72 = arith.constant 72 : index
    %c0_1 = arith.constant 0 : index
    %1 = vector.load %arg13[%c72, %c0_1] : memref<88x256xf32, #tpu.memory_space<vmem>>, vector<16x256xf32>
    tpu.vector_store %arg13[%c72, %c0_1], %0 {strides = array<i32>} : memref<88x256xf32, #tpu.memory_space<vmem>>, vector<16x256xf32>,
    %c0_2 = arith.constant 0 : index
    %c0_3 = arith.constant 0 : index
    %2 = vector.load %arg1[%c0_2, %c0_3] : memref<8x256xf32, #tpu.memory_space<vmem>>, vector<8x256xf32>
    %c0_4 = arith.constant 0 : index
    %c0_5 = arith.constant 0 : index
    %3 = vector.load %arg4[%c0_4, %c0_5] : memref<8x1xf32, #tpu.memory_space<vmem>>, vector<8x1xf32>
    %c0_6 = arith.constant 0 : index
    %c0_7 = arith.constant 0 : index
    %4 = vector.load %arg5[%c0_6, %c0_7] : memref<8x1xf32, #tpu.memory_space<vmem>>, vector<8x1xf32>
    %cst = arith.constant dense<0.000000e+00> : vector<8xf32>
    %5 = vector.multi_reduction <add>, %2, %cst [1] : vector<8x256xf32> to vector<8xf32>
    %6 = vector.shape_cast %5 : vector<8xf32> to vector<8x1xf32>
    %7 = arith.mulf %2, %2 : vector<8x256xf32>
    %cst_8 = arith.constant dense<0.000000e+00> : vector<8xf32>
    %8 = vector.multi_reduction <add>, %7, %cst_8 [1] : vector<8x256xf32> to vector<8xf32>
    %9 = vector.shape_cast %8 : vector<8xf32> to vector<8x1xf32>
    %cst_9 = arith.constant 3.906250e-03 : f32
    %10 = vector.broadcast %cst_9 : f32 to vector<8x1xf32>
    %11 = arith.mulf %6, %10 : vector<8x1xf32>
    %cst_10 = arith.constant 3.906250e-03 : f32
    %12 = vector.broadcast %cst_10 : f32 to vector<8x1xf32>
    %13 = arith.mulf %9, %12 : vector<8x1xf32>
    %14 = arith.mulf %11, %11 : vector<8x1xf32>
    %15 = arith.subf %13, %14 : vector<8x1xf32>
    %cst_11 = arith.constant 0.000000e+00 : f32
    %16 = vector.broadcast %cst_11 : f32 to vector<8x1xf32>
    %17 = arith.maximumf %15, %16 : vector<8x1xf32>
    %cst_12 = arith.constant 9.99999974E-6 : f32
    %18 = vector.broadcast %cst_12 : f32 to vector<8x1xf32>
    %19 = arith.addf %17, %18 : vector<8x1xf32>
    %20 = math.rsqrt %19 : vector<8x1xf32>
    %21 = arith.mulf %20, %3 : vector<8x1xf32>
    %22 = arith.mulf %11, %21 : vector<8x1xf32>
    %23 = arith.subf %4, %22 : vector<8x1xf32>
    %24 = vector.broadcast %21 : vector<8x1xf32> to vector<8x256xf32>
    %25 = arith.mulf %2, %24 : vector<8x256xf32>
    %26 = vector.broadcast %23 : vector<8x1xf32> to vector<8x256xf32>
    %27 = arith.addf %25, %26 : vector<8x256xf32>
    %cst_13 = arith.constant 0.000000e+00 : f32
    %28 = vector.broadcast %cst_13 : f32 to vector<8x256xf32>
    %29 = arith.maximumf %27, %28 : vector<8x256xf32>
    %c0_14 = arith.constant 0 : index
    %c0_15 = arith.constant 0 : index
    %30 = vector.load %arg6[%c0_14, %c0_15] : memref<8x88xf32, #tpu.memory_space<vmem>>, vector<8x88xf32>
    %c17_i32 = arith.constant 17 : i32
    %31 = tpu.dynamic_rotate %29 by %c17_i32 dim 1 : vector<8x256xf32>, i32 -> vector<8x256xf32>
    %c0_16 = arith.constant 0 : index
    %c0_17 = arith.constant 0 : index
    %32 = vector.load %arg2[%c0_16, %c0_17] : memref<72x256xf32, #tpu.memory_space<vmem>>, vector<8x256xf32>
    %33 = arith.mulf %31, %32 : vector<8x256xf32>
    %c0_18 = arith.constant 0 : index
    %c0_19 = arith.constant 0 : index
    %34 = vector.load %arg13[%c0_18, %c0_19] : memref<88x256xf32, #tpu.memory_space<vmem>>, vector<8x256xf32>
    tpu.vector_store %arg13[%c0_18, %c0_19], %33 {strides = array<i32>} : memref<88x256xf32, #tpu.memory_space<vmem>>, vector<8x256xf32>,
    %c16_i32 = arith.constant 16 : i32
    %35 = tpu.dynamic_rotate %29 by %c16_i32 dim 1 : vector<8x256xf32>, i32 -> vector<8x256xf32>
    %c8 = arith.constant 8 : index
    %c0_20 = arith.constant 0 : index
    %36 = vector.load %arg2[%c8, %c0_20] : memref<72x256xf32, #tpu.memory_space<vmem>>, vector<8x256xf32>
    %37 = arith.mulf %35, %36 : vector<8x256xf32>
    %c8_21 = arith.constant 8 : index
    %c0_22 = arith.constant 0 : index
    %38 = vector.load %arg13[%c8_21, %c0_22] : memref<88x256xf32, #tpu.memory_space<vmem>>, vector<8x256xf32>
    tpu.vector_store %arg13[%c8_21, %c0_22], %37 {strides = array<i32>} : memref<88x256xf32, #tpu.memory_space<vmem>>, vector<8x256xf32>,
    %c15_i32 = arith.constant 15 : i32
    %39 = tpu.dynamic_rotate %29 by %c15_i32 dim 1 : vector<8x256xf32>, i32 -> vector<8x256xf32>
    %c16 = arith.constant 16 : index
    %c0_23 = arith.constant 0 : index
    %40 = vector.load %arg2[%c16, %c0_23] : memref<72x256xf32, #tpu.memory_space<vmem>>, vector<8x256xf32>
    %41 = arith.mulf %39, %40 : vector<8x256xf32>
    %c16_24 = arith.constant 16 : index
    %c0_25 = arith.constant 0 : index
    %42 = vector.load %arg13[%c16_24, %c0_25] : memref<88x256xf32, #tpu.memory_space<vmem>>, vector<8x256xf32>
    tpu.vector_store %arg13[%c16_24, %c0_25], %41 {strides = array<i32>} : memref<88x256xf32, #tpu.memory_space<vmem>>, vector<8x256xf32>,
    %c1_i32 = arith.constant 1 : i32
    %43 = tpu.dynamic_rotate %29 by %c1_i32 dim 1 : vector<8x256xf32>, i32 -> vector<8x256xf32>
    %c24 = arith.constant 24 : index
    %c0_26 = arith.constant 0 : index
    %44 = vector.load %arg2[%c24, %c0_26] : memref<72x256xf32, #tpu.memory_space<vmem>>, vector<8x256xf32>
    %45 = arith.mulf %43, %44 : vector<8x256xf32>
    %c24_27 = arith.constant 24 : index
    %c0_28 = arith.constant 0 : index
    %46 = vector.load %arg13[%c24_27, %c0_28] : memref<88x256xf32, #tpu.memory_space<vmem>>, vector<8x256xf32>
    tpu.vector_store %arg13[%c24_27, %c0_28], %45 {strides = array<i32>} : memref<88x256xf32, #tpu.memory_space<vmem>>, vector<8x256xf32>,
    %c32 = arith.constant 32 : index
    %c0_29 = arith.constant 0 : index
    %47 = vector.load %arg13[%c32, %c0_29] : memref<88x256xf32, #tpu.memory_space<vmem>>, vector<8x256xf32>
    tpu.vector_store %arg13[%c32, %c0_29], %29 {strides = array<i32>} : memref<88x256xf32, #tpu.memory_space<vmem>>, vector<8x256xf32>,
    %c255_i32 = arith.constant 255 : i32
    %48 = tpu.dynamic_rotate %29 by %c255_i32 dim 1 : vector<8x256xf32>, i32 -> vector<8x256xf32>
    %c40 = arith.constant 40 : index
    %c0_30 = arith.constant 0 : index
    %49 = vector.load %arg2[%c40, %c0_30] : memref<72x256xf32, #tpu.memory_space<vmem>>, vector<8x256xf32>
    %50 = arith.mulf %48, %49 : vector<8x256xf32>
    %c40_31 = arith.constant 40 : index
    %c0_32 = arith.constant 0 : index
    %51 = vector.load %arg13[%c40_31, %c0_32] : memref<88x256xf32, #tpu.memory_space<vmem>>, vector<8x256xf32>
    tpu.vector_store %arg13[%c40_31, %c0_32], %50 {strides = array<i32>} : memref<88x256xf32, #tpu.memory_space<vmem>>, vector<8x256xf32>,
    %c241_i32 = arith.constant 241 : i32
    %52 = tpu.dynamic_rotate %29 by %c241_i32 dim 1 : vector<8x256xf32>, i32 -> vector<8x256xf32>
    %c48 = arith.constant 48 : index
    %c0_33 = arith.constant 0 : index
    %53 = vector.load %arg2[%c48, %c0_33] : memref<72x256xf32, #tpu.memory_space<vmem>>, vector<8x256xf32>
    %54 = arith.mulf %52, %53 : vector<8x256xf32>
    %c48_34 = arith.constant 48 : index
    %c0_35 = arith.constant 0 : index
    %55 = vector.load %arg13[%c48_34, %c0_35] : memref<88x256xf32, #tpu.memory_space<vmem>>, vector<8x256xf32>
    tpu.vector_store %arg13[%c48_34, %c0_35], %54 {strides = array<i32>} : memref<88x256xf32, #tpu.memory_space<vmem>>, vector<8x256xf32>,
    %c240_i32 = arith.constant 240 : i32
    %56 = tpu.dynamic_rotate %29 by %c240_i32 dim 1 : vector<8x256xf32>, i32 -> vector<8x256xf32>
    %c56 = arith.constant 56 : index
    %c0_36 = arith.constant 0 : index
    %57 = vector.load %arg2[%c56, %c0_36] : memref<72x256xf32, #tpu.memory_space<vmem>>, vector<8x256xf32>
    %58 = arith.mulf %56, %57 : vector<8x256xf32>
    %c56_37 = arith.constant 56 : index
    %c0_38 = arith.constant 0 : index
    %59 = vector.load %arg13[%c56_37, %c0_38] : memref<88x256xf32, #tpu.memory_space<vmem>>, vector<8x256xf32>
    tpu.vector_store %arg13[%c56_37, %c0_38], %58 {strides = array<i32>} : memref<88x256xf32, #tpu.memory_space<vmem>>, vector<8x256xf32>,
    %c239_i32 = arith.constant 239 : i32
    %60 = tpu.dynamic_rotate %29 by %c239_i32 dim 1 : vector<8x256xf32>, i32 -> vector<8x256xf32>
    %c64 = arith.constant 64 : index
    %c0_39 = arith.constant 0 : index
    %61 = vector.load %arg2[%c64, %c0_39] : memref<72x256xf32, #tpu.memory_space<vmem>>, vector<8x256xf32>
    %62 = arith.mulf %60, %61 : vector<8x256xf32>
    %c64_40 = arith.constant 64 : index
    %c0_41 = arith.constant 0 : index
    %63 = vector.load %arg13[%c64_40, %c0_41] : memref<88x256xf32, #tpu.memory_space<vmem>>, vector<8x256xf32>
    tpu.vector_store %arg13[%c64_40, %c0_41], %62 {strides = array<i32>} : memref<88x256xf32, #tpu.memory_space<vmem>>, vector<8x256xf32>,
    %c0_42 = arith.constant 0 : index
    %c0_43 = arith.constant 0 : index
    %64 = vector.load %arg13[%c0_42, %c0_43] : memref<88x256xf32, #tpu.memory_space<vmem>>, vector<88x256xf32>
    %cst_44 = arith.constant dense<0.000000e+00> : vector<8x256xf32>
    %65 = tpu.matmul %30, %64, %cst_44 {dimension_numbers = #tpu.dot_dimension_numbers<[1], [0], [0], [1], [0, 0, 1, 1], [], []>} : vector<8x88xf32>, vector<88x256xf32>, vector<8x256xf32> -> vector<8x256xf32>
    %c0_45 = arith.constant 0 : index
    %c0_46 = arith.constant 0 : index
    %66 = vector.load %arg7[%c0_45, %c0_46] : memref<8x1xf32, #tpu.memory_space<vmem>>, vector<8x1xf32>
    %c0_47 = arith.constant 0 : index
    %c0_48 = arith.constant 0 : index
    %67 = vector.load %arg8[%c0_47, %c0_48] : memref<8x1xf32, #tpu.memory_space<vmem>>, vector<8x1xf32>
    %cst_49 = arith.constant dense<0.000000e+00> : vector<8xf32>
    %68 = vector.multi_reduction <add>, %65, %cst_49 [1] : vector<8x256xf32> to vector<8xf32>
    %69 = vector.shape_cast %68 : vector<8xf32> to vector<8x1xf32>
    %70 = arith.mulf %65, %65 : vector<8x256xf32>
    %cst_50 = arith.constant dense<0.000000e+00> : vector<8xf32>
    %71 = vector.multi_reduction <add>, %70, %cst_50 [1] : vector<8x256xf32> to vector<8xf32>
    %72 = vector.shape_cast %71 : vector<8xf32> to vector<8x1xf32>
    %cst_51 = arith.constant 3.906250e-03 : f32
    %73 = vector.broadcast %cst_51 : f32 to vector<8x1xf32>
    %74 = arith.mulf %69, %73 : vector<8x1xf32>
    %cst_52 = arith.constant 3.906250e-03 : f32
    %75 = vector.broadcast %cst_52 : f32 to vector<8x1xf32>
    %76 = arith.mulf %72, %75 : vector<8x1xf32>
    %77 = arith.mulf %74, %74 : vector<8x1xf32>
    %78 = arith.subf %76, %77 : vector<8x1xf32>
    %cst_53 = arith.constant 0.000000e+00 : f32
    %79 = vector.broadcast %cst_53 : f32 to vector<8x1xf32>
    %80 = arith.maximumf %78, %79 : vector<8x1xf32>
    %cst_54 = arith.constant 9.99999974E-6 : f32
    %81 = vector.broadcast %cst_54 : f32 to vector<8x1xf32>
    %82 = arith.addf %80, %81 : vector<8x1xf32>
    %83 = math.rsqrt %82 : vector<8x1xf32>
    %84 = arith.mulf %83, %66 : vector<8x1xf32>
    %85 = arith.mulf %74, %84 : vector<8x1xf32>
    %86 = arith.subf %67, %85 : vector<8x1xf32>
    %87 = vector.broadcast %84 : vector<8x1xf32> to vector<8x256xf32>
    %88 = arith.mulf %65, %87 : vector<8x256xf32>
    %89 = vector.broadcast %86 : vector<8x1xf32> to vector<8x256xf32>
    %90 = arith.addf %88, %89 : vector<8x256xf32>
    %cst_55 = arith.constant 0.000000e+00 : f32
    %91 = vector.broadcast %cst_55 : f32 to vector<8x256xf32>
    %92 = arith.maximumf %90, %91 : vector<8x256xf32>
    %c0_56 = arith.constant 0 : index
    %c0_57 = arith.constant 0 : index
    %93 = vector.load %arg9[%c0_56, %c0_57] : memref<8x88xf32, #tpu.memory_space<vmem>>, vector<8x88xf32>
    %c17_i32_58 = arith.constant 17 : i32
    %94 = tpu.dynamic_rotate %92 by %c17_i32_58 dim 1 : vector<8x256xf32>, i32 -> vector<8x256xf32>
    %c0_59 = arith.constant 0 : index
    %c0_60 = arith.constant 0 : index
    %95 = vector.load %arg2[%c0_59, %c0_60] : memref<72x256xf32, #tpu.memory_space<vmem>>, vector<8x256xf32>
    %96 = arith.mulf %94, %95 : vector<8x256xf32>
    %c0_61 = arith.constant 0 : index
    %c0_62 = arith.constant 0 : index
    %97 = vector.load %arg13[%c0_61, %c0_62] : memref<88x256xf32, #tpu.memory_space<vmem>>, vector<8x256xf32>
    tpu.vector_store %arg13[%c0_61, %c0_62], %96 {strides = array<i32>} : memref<88x256xf32, #tpu.memory_space<vmem>>, vector<8x256xf32>,
    %c16_i32_63 = arith.constant 16 : i32
    %98 = tpu.dynamic_rotate %92 by %c16_i32_63 dim 1 : vector<8x256xf32>, i32 -> vector<8x256xf32>
    %c8_64 = arith.constant 8 : index
    %c0_65 = arith.constant 0 : index
    %99 = vector.load %arg2[%c8_64, %c0_65] : memref<72x256xf32, #tpu.memory_space<vmem>>, vector<8x256xf32>
    %100 = arith.mulf %98, %99 : vector<8x256xf32>
    %c8_66 = arith.constant 8 : index
    %c0_67 = arith.constant 0 : index
    %101 = vector.load %arg13[%c8_66, %c0_67] : memref<88x256xf32, #tpu.memory_space<vmem>>, vector<8x256xf32>
    tpu.vector_store %arg13[%c8_66, %c0_67], %100 {strides = array<i32>} : memref<88x256xf32, #tpu.memory_space<vmem>>, vector<8x256xf32>,
    %c15_i32_68 = arith.constant 15 : i32
    %102 = tpu.dynamic_rotate %92 by %c15_i32_68 dim 1 : vector<8x256xf32>, i32 -> vector<8x256xf32>
    %c16_69 = arith.constant 16 : index
    %c0_70 = arith.constant 0 : index
    %103 = vector.load %arg2[%c16_69, %c0_70] : memref<72x256xf32, #tpu.memory_space<vmem>>, vector<8x256xf32>
    %104 = arith.mulf %102, %103 : vector<8x256xf32>
    %c16_71 = arith.constant 16 : index
    %c0_72 = arith.constant 0 : index
    %105 = vector.load %arg13[%c16_71, %c0_72] : memref<88x256xf32, #tpu.memory_space<vmem>>, vector<8x256xf32>
    tpu.vector_store %arg13[%c16_71, %c0_72], %104 {strides = array<i32>} : memref<88x256xf32, #tpu.memory_space<vmem>>, vector<8x256xf32>,
    %c1_i32_73 = arith.constant 1 : i32
    %106 = tpu.dynamic_rotate %92 by %c1_i32_73 dim 1 : vector<8x256xf32>, i32 -> vector<8x256xf32>
    %c24_74 = arith.constant 24 : index
    %c0_75 = arith.constant 0 : index
    %107 = vector.load %arg2[%c24_74, %c0_75] : memref<72x256xf32, #tpu.memory_space<vmem>>, vector<8x256xf32>
    %108 = arith.mulf %106, %107 : vector<8x256xf32>
    %c24_76 = arith.constant 24 : index
    %c0_77 = arith.constant 0 : index
    %109 = vector.load %arg13[%c24_76, %c0_77] : memref<88x256xf32, #tpu.memory_space<vmem>>, vector<8x256xf32>
    tpu.vector_store %arg13[%c24_76, %c0_77], %108 {strides = array<i32>} : memref<88x256xf32, #tpu.memory_space<vmem>>, vector<8x256xf32>,
    %c32_78 = arith.constant 32 : index
    %c0_79 = arith.constant 0 : index
    %110 = vector.load %arg13[%c32_78, %c0_79] : memref<88x256xf32, #tpu.memory_space<vmem>>, vector<8x256xf32>
    tpu.vector_store %arg13[%c32_78, %c0_79], %92 {strides = array<i32>} : memref<88x256xf32, #tpu.memory_space<vmem>>, vector<8x256xf32>,
    %c255_i32_80 = arith.constant 255 : i32
    %111 = tpu.dynamic_rotate %92 by %c255_i32_80 dim 1 : vector<8x256xf32>, i32 -> vector<8x256xf32>
    %c40_81 = arith.constant 40 : index
    %c0_82 = arith.constant 0 : index
    %112 = vector.load %arg2[%c40_81, %c0_82] : memref<72x256xf32, #tpu.memory_space<vmem>>, vector<8x256xf32>
    %113 = arith.mulf %111, %112 : vector<8x256xf32>
    %c40_83 = arith.constant 40 : index
    %c0_84 = arith.constant 0 : index
    %114 = vector.load %arg13[%c40_83, %c0_84] : memref<88x256xf32, #tpu.memory_space<vmem>>, vector<8x256xf32>
    tpu.vector_store %arg13[%c40_83, %c0_84], %113 {strides = array<i32>} : memref<88x256xf32, #tpu.memory_space<vmem>>, vector<8x256xf32>,
    %c241_i32_85 = arith.constant 241 : i32
    %115 = tpu.dynamic_rotate %92 by %c241_i32_85 dim 1 : vector<8x256xf32>, i32 -> vector<8x256xf32>
    %c48_86 = arith.constant 48 : index
    %c0_87 = arith.constant 0 : index
    %116 = vector.load %arg2[%c48_86, %c0_87] : memref<72x256xf32, #tpu.memory_space<vmem>>, vector<8x256xf32>
    %117 = arith.mulf %115, %116 : vector<8x256xf32>
    %c48_88 = arith.constant 48 : index
    %c0_89 = arith.constant 0 : index
    %118 = vector.load %arg13[%c48_88, %c0_89] : memref<88x256xf32, #tpu.memory_space<vmem>>, vector<8x256xf32>
    tpu.vector_store %arg13[%c48_88, %c0_89], %117 {strides = array<i32>} : memref<88x256xf32, #tpu.memory_space<vmem>>, vector<8x256xf32>,
    %c240_i32_90 = arith.constant 240 : i32
    %119 = tpu.dynamic_rotate %92 by %c240_i32_90 dim 1 : vector<8x256xf32>, i32 -> vector<8x256xf32>
    %c56_91 = arith.constant 56 : index
    %c0_92 = arith.constant 0 : index
    %120 = vector.load %arg2[%c56_91, %c0_92] : memref<72x256xf32, #tpu.memory_space<vmem>>, vector<8x256xf32>
    %121 = arith.mulf %119, %120 : vector<8x256xf32>
    %c56_93 = arith.constant 56 : index
    %c0_94 = arith.constant 0 : index
    %122 = vector.load %arg13[%c56_93, %c0_94] : memref<88x256xf32, #tpu.memory_space<vmem>>, vector<8x256xf32>
    tpu.vector_store %arg13[%c56_93, %c0_94], %121 {strides = array<i32>} : memref<88x256xf32, #tpu.memory_space<vmem>>, vector<8x256xf32>,
    %c239_i32_95 = arith.constant 239 : i32
    %123 = tpu.dynamic_rotate %92 by %c239_i32_95 dim 1 : vector<8x256xf32>, i32 -> vector<8x256xf32>
    %c64_96 = arith.constant 64 : index
    %c0_97 = arith.constant 0 : index
    %124 = vector.load %arg2[%c64_96, %c0_97] : memref<72x256xf32, #tpu.memory_space<vmem>>, vector<8x256xf32>
    %125 = arith.mulf %123, %124 : vector<8x256xf32>
    %c64_98 = arith.constant 64 : index
    %c0_99 = arith.constant 0 : index
    %126 = vector.load %arg13[%c64_98, %c0_99] : memref<88x256xf32, #tpu.memory_space<vmem>>, vector<8x256xf32>
    tpu.vector_store %arg13[%c64_98, %c0_99], %125 {strides = array<i32>} : memref<88x256xf32, #tpu.memory_space<vmem>>, vector<8x256xf32>,
    %c0_100 = arith.constant 0 : index
    %c0_101 = arith.constant 0 : index
    %127 = vector.load %arg13[%c0_100, %c0_101] : memref<88x256xf32, #tpu.memory_space<vmem>>, vector<88x256xf32>
    %cst_102 = arith.constant dense<0.000000e+00> : vector<8x256xf32>
    %128 = tpu.matmul %93, %127, %cst_102 {dimension_numbers = #tpu.dot_dimension_numbers<[1], [0], [0], [1], [0, 0, 1, 1], [], []>} : vector<8x88xf32>, vector<88x256xf32>, vector<8x256xf32> -> vector<8x256xf32>
    %c0_103 = arith.constant 0 : index
    %c0_104 = arith.constant 0 : index
    %129 = vector.load %arg10[%c0_103, %c0_104] : memref<8x1xf32, #tpu.memory_space<vmem>>, vector<8x1xf32>
    %c0_105 = arith.constant 0 : index
    %c0_106 = arith.constant 0 : index
    %130 = vector.load %arg11[%c0_105, %c0_106] : memref<8x1xf32, #tpu.memory_space<vmem>>, vector<8x1xf32>
    %cst_107 = arith.constant dense<0.000000e+00> : vector<8xf32>
    %131 = vector.multi_reduction <add>, %128, %cst_107 [1] : vector<8x256xf32> to vector<8xf32>
    %132 = vector.shape_cast %131 : vector<8xf32> to vector<8x1xf32>
    %133 = arith.mulf %128, %128 : vector<8x256xf32>
    %cst_108 = arith.constant dense<0.000000e+00> : vector<8xf32>
    %134 = vector.multi_reduction <add>, %133, %cst_108 [1] : vector<8x256xf32> to vector<8xf32>
    %135 = vector.shape_cast %134 : vector<8xf32> to vector<8x1xf32>
    %cst_109 = arith.constant 3.906250e-03 : f32
    %136 = vector.broadcast %cst_109 : f32 to vector<8x1xf32>
    %137 = arith.mulf %132, %136 : vector<8x1xf32>
    %cst_110 = arith.constant 3.906250e-03 : f32
    %138 = vector.broadcast %cst_110 : f32 to vector<8x1xf32>
    %139 = arith.mulf %135, %138 : vector<8x1xf32>
    %140 = arith.mulf %137, %137 : vector<8x1xf32>
    %141 = arith.subf %139, %140 : vector<8x1xf32>
    %cst_111 = arith.constant 0.000000e+00 : f32
    %142 = vector.broadcast %cst_111 : f32 to vector<8x1xf32>
    %143 = arith.maximumf %141, %142 : vector<8x1xf32>
    %cst_112 = arith.constant 9.99999974E-6 : f32
    %144 = vector.broadcast %cst_112 : f32 to vector<8x1xf32>
    %145 = arith.addf %143, %144 : vector<8x1xf32>
    %146 = math.rsqrt %145 : vector<8x1xf32>
    %147 = arith.mulf %146, %129 : vector<8x1xf32>
    %148 = arith.mulf %137, %147 : vector<8x1xf32>
    %149 = arith.subf %130, %148 : vector<8x1xf32>
    %150 = vector.broadcast %147 : vector<8x1xf32> to vector<8x256xf32>
    %151 = arith.mulf %128, %150 : vector<8x256xf32>
    %152 = vector.broadcast %149 : vector<8x1xf32> to vector<8x256xf32>
    %153 = arith.addf %151, %152 : vector<8x256xf32>
    %c0_113 = arith.constant 0 : index
    %c0_114 = arith.constant 0 : index
    %154 = vector.load %arg12[%c0_113, %c0_114] : memref<8x256xf32, #tpu.memory_space<vmem>>, vector<8x256xf32>
    tpu.vector_store %arg12[%c0_113, %c0_114], %153 {strides = array<i32>} : memref<8x256xf32, #tpu.memory_space<vmem>>, vector<8x256xf32>,
    return
  }
  func.func @transform_0(%arg0: i32) -> (i32, i32) {
    %c0_i32 = arith.constant 0 : i32
    %c0_i32_0 = arith.constant 0 : i32
    return %c0_i32, %arg0 : i32, i32
  }
  func.func @transform_1(%arg0: i32) -> (i32, i32) {
    %c0_i32 = arith.constant 0 : i32
    %c0_i32_0 = arith.constant 0 : i32
    %c0_i32_1 = arith.constant 0 : i32
    return %c0_i32, %c0_i32_0 : i32, i32
  }
  func.func @transform_2(%arg0: i32) -> (i32, i32) {
    %c0_i32 = arith.constant 0 : i32
    %c0_i32_0 = arith.constant 0 : i32
    %c0_i32_1 = arith.constant 0 : i32
    return %c0_i32, %c0_i32_0 : i32, i32
  }
  func.func @transform_3(%arg0: i32) -> (i32, i32) {
    %c0_i32 = arith.constant 0 : i32
    %c0_i32_0 = arith.constant 0 : i32
    %c0_i32_1 = arith.constant 0 : i32
    return %c0_i32, %c0_i32_0 : i32, i32
  }
  func.func @transform_4(%arg0: i32) -> (i32, i32) {
    %c0_i32 = arith.constant 0 : i32
    %c0_i32_0 = arith.constant 0 : i32
    %c0_i32_1 = arith.constant 0 : i32
    return %c0_i32, %c0_i32_0 : i32, i32
  }
  func.func @transform_5(%arg0: i32) -> (i32, i32) {
    %c0_i32 = arith.constant 0 : i32
    %c0_i32_0 = arith.constant 0 : i32
    %c0_i32_1 = arith.constant 0 : i32
    return %c0_i32, %c0_i32_0 : i32, i32
  }
  func.func @transform_6(%arg0: i32) -> (i32, i32) {
    %c0_i32 = arith.constant 0 : i32
    %c0_i32_0 = arith.constant 0 : i32
    %c0_i32_1 = arith.constant 0 : i32
    return %c0_i32, %c0_i32_0 : i32, i32
  }
  func.func @transform_7(%arg0: i32) -> (i32, i32) {
    %c0_i32 = arith.constant 0 : i32
    %c0_i32_0 = arith.constant 0 : i32
    %c0_i32_1 = arith.constant 0 : i32
    return %c0_i32, %c0_i32_0 : i32, i32
  }
  func.func @transform_8(%arg0: i32) -> (i32, i32) {
    %c0_i32 = arith.constant 0 : i32
    %c0_i32_0 = arith.constant 0 : i32
    %c0_i32_1 = arith.constant 0 : i32
    return %c0_i32, %c0_i32_0 : i32, i32
  }
  func.func @transform_9(%arg0: i32) -> (i32, i32) {
    %c0_i32 = arith.constant 0 : i32
    %c0_i32_0 = arith.constant 0 : i32
    %c0_i32_1 = arith.constant 0 : i32
    return %c0_i32, %c0_i32_0 : i32, i32
  }
  func.func @transform_10(%arg0: i32) -> (i32, i32) {
    %c0_i32 = arith.constant 0 : i32
    %c0_i32_0 = arith.constant 0 : i32
    %c0_i32_1 = arith.constant 0 : i32
    return %c0_i32, %c0_i32_0 : i32, i32
  }
  func.func @transform_11(%arg0: i32) -> (i32, i32) {
    %c0_i32 = arith.constant 0 : i32
    %c0_i32_0 = arith.constant 0 : i32
    return %c0_i32, %arg0 : i32, i32
  }
}

</mosaic_0001>

<bundles_post_ra>
// kernel: tpu_custom_call.1
= control target key start
LH: loop header
LB: loop body
LE: loop exit
PB: predicated region body
PF: predicated region fallthrough
CT: control target
= control target key end

     0   :  { %16 = vsyncpa [#allocation4], 0  ;;  %s1791_s0 = inlined_call_operand.vmem [shape: f32[8,512], index: 0, kind: input, shape index: {}]   ;;  %s1792_s1 = inlined_call_operand.hbm [shape: f32[72,256], index: 1, kind: input, shape index: {}]   ;;  %s1793_s2 = inlined_call_operand.hbm [shape: f32[16,256], index: 2, kind: input, shape index: {}]   ;;  %s1794_s3 = inlined_call_operand.vmem [shape: f32[8,1], index: 3, kind: input, shape index: {}]   ;;  %s1795_s4 = inlined_call_operand.vmem [shape: f32[8,1], index: 4, kind: input, shape index: {}]   ;;  %s1796_s5 = inlined_call_operand.vmem [shape: f32[8,88], index: 5, kind: input, shape index: {}]   ;;  %s1797_s6 = inlined_call_operand.vmem [shape: f32[8,1], index: 6, kind: input, shape index: {}]   ;;  %s1798_s7 = inlined_call_operand.vmem [shape: f32[8,1], index: 7, kind: input, shape index: {}]   ;;  %s1799_s8 = inlined_call_operand.vmem [shape: f32[8,88], index: 8, kind: input, shape index: {}]   ;;  %s1800_s9 = inlined_call_operand.vmem [shape: f32[8,1], index: 9, kind: input, shape index: {}]   ;;  %s1801_s10 = inlined_call_operand.vmem [shape: f32[8,1], index: 10, kind: input, shape index: {}]   ;;  %s1802_s11 = inlined_call_operand.hbm [shape: f32[8,512], index: 11, kind: output, shape index: {}]  }
   0x1   :  { %17 = vsyncpa [#allocation7], 0 }
   0x2   :  { %18 = vsyncpa [#allocation5], 0 }
   0x3   :  { %20 = vsyncpa [#allocation5 + $0x1], 0  ;;  %s1375_s17 = smov 0   ;;  %s1377_s18 = smov 0  }
   0x4   :  { %s1379_s19 = smov 0   ;;  %s1381_s20 = smov 0  }
   0x5 LB: > { %1811 = sst [smem:[#allocation12_spill]] %s1286_s17  ;;  %s1396_s21 = sadd.s32 4294967295, %s1298_s20   ;;  %s1298_s20 = sphi %s1381_s20, %s1829_s20   ;;  %s1294_s19 = sphi %s1379_s19, %s1831_s19   ;;  %s1290_s18 = sphi %s1377_s18, %s1833_s18   ;;  %s1286_s17 = sphi %s1375_s17, %s1832_s17  }
   0x6   : > { %1812 = sst [smem:[#allocation13_spill]] %s1294_s19  ;;  %s1033_s22 = sadd.s32 4294967294, %s1298_s20  }
   0x7   : > { %s1400_s23 = sadd.s32 1, %s1298_s20   ;;  %s269_s24 = sadd.s32 1, %s1294_s19 }
   0x8   : > { %1813 = sst [smem:[#allocation14_spill]] %s1400_s23  ;;  %s266_s25 = ssub.s32 %s1298_s20, %s1400_s23 }
   0x9   : > { %p279_p0 = scmp.ne.s32.totalorder %s1294_s19, %s1290_s18  ;;  %p267_p1 = scmp.eq.s32.totalorder %s266_s25, 0 }
   0xa   : > { %p280_p2 = scmp.eq.s32.totalorder %s1396_s21, 1  ;;  %p285_p3 = scmp.ne.s32.totalorder %s1290_s18, %s1286_s17 }
   0xb   : > { %p286_p4 = scmp.eq.s32.totalorder %s1033_s22, 1  ;;  %p1034_p7 = scmp.ge.s32.totalorder %s1298_s20, 1 }
   0xc   : > { %s1411_s26 = scalar_select %p267_p1, %s1294_s19, %s269_s24  }
   0xd   : > { %p1413_p5 = por %p280_p2, %p279_p0  ;;  %p1417_p6 = por %p286_p4, %p285_p3 }
   0xe   : > { %1814 = sst [smem:[#allocation15_spill]] %s1411_s26  ;;  %p293_p8 = scmp.lt.s32.totalorder %s1298_s20, 3 }
   0xf   : > { %s1815_s27 = scalar_select %p1413_p5, 1, 0 }
  0x10   : > { %s1816_s28 = scalar_select %p1417_p6, 1, 0 }
  0x11   : > { %p1804_p9 = scmp.eq.s32.totalorder %s1396_s21, 0  ;;  %p1424_p10 = pnand %p1034_p7, %p293_p8 }
  0x12   : > { %1817 = sst [smem:[#allocation16_spill]] %s1816_s28  ;;  %s1300_s30 = smov [#allocation3]  }
  0x13   : > { %s1818_s29 = scalar_select %p1424_p10, 1, 0 }
  0x14   : > { %s305_s12 = sshll.u32 %s1300_s30, 4  ;;  %p1102_p11 = pneg %p1424_p10  ;;  %s306_s12 = int_to_ptr.vmem [resolvable:$true] %s305_s12 }
  0x15   : > { %s1301_s14 = smov [#allocation6]   ;;  %s1172_s24 = scalar_lea.hbm %s1792_s1, 2304 }
  0x16   : > { %p1432_p12 = pnand %p1804_p9, %p1102_p11  ;;  %s318_s15 = sshll.u32 %s1301_s14, 4  ;;  %s1436_s15 = int_to_ptr.vmem [resolvable:$true] %s318_s15 }
  0x17   : > { %p1173_p13 = scmp.ne.s32.totalorder %s1792_s1, %s1172_s24  ;;  %p1179_p3 = scmp.lt.u32.totalorder %s1172_s24, %s1792_s1 }
  0x18   : > { %p1174_p0 = pneg %p1432_p12 }
  0x1a   : > { %p1175_p1 = pnand %p1174_p0, %p1173_p13 }
  0x1c   : > { %p1176_p2 = pneg %p1175_p1 }
  0x1e   : > { %p1181_p4 = pnand %p1179_p3, %p1176_p2 }
  0x20   : > { %1184 = shalt.err (!%p1181_p4)
}
  0x21   : > { %s1185_s14 = scalar_lea.vmem %s306_s12, 2304  ;;  %p1193_p9 = scmp.lt.s32.totalorder %s306_s12, %s306_s12 }
  0x22   : > { %p1186_p7 = scmp.ne.s32.totalorder %s306_s12, %s1185_s14  ;;  %p1194_p6 = scmp.lt.s32.totalorder %s1185_s14, %s1185_s14 }
  0x24   : > { %p1188_p8 = pnand %p1186_p7, %p1174_p0  ;;  %p1195_p5 = por %p1194_p6, %p1193_p9 }
  0x26   : > { %p1189_p11 = pneg %p1188_p8 }
  0x28   : > { %p1196_p10 = pnand %p1195_p5, %p1189_p11 }
  0x2a   : > { %1199 = shalt.err (!%p1196_p10)
}
  0x2b   : > { %s1302_s16 = smov 256   ;;  %s1303_s22 = smov 16  }
  0x2c   : > { %1105 = dma.hbm_to_vmem [thread:$0]  (!%p1432_p12), %s1792_s1, 2304, %s306_s12, [#allocation4], %s1302_s16, %s1302_s16, %s1303_s22  }
  0x2d   : > { %s1200_s30 = scalar_lea.hbm %s1793_s2, 512 }
  0x2e   : > { %p1201_p13 = scmp.ne.s32.totalorder %s1793_s2, %s1200_s30  ;;  %p1207_p9 = scmp.lt.u32.totalorder %s1200_s30, %s1793_s2 }
  0x30   : > { %p1203_p5 = pnand %p1201_p13, %p1174_p0 }
  0x32   : > { %p1204_p6 = pneg %p1203_p5 }
  0x34   : > { %p1209_p10 = pnand %p1207_p9, %p1204_p6 }
  0x36   : > { %1212 = shalt.err (!%p1209_p10)
}
  0x37   : > { %s1213_s12 = scalar_lea.vmem %s1436_s15, 512  ;;  %p1221_p4 = scmp.lt.s32.totalorder %s1436_s15, %s1436_s15 }
  0x38   : > { %p1214_p1 = scmp.ne.s32.totalorder %s1436_s15, %s1213_s12  ;;  %p1222_p7 = scmp.lt.s32.totalorder %s1213_s12, %s1213_s12 }
  0x3a   : > { %p1216_p2 = pnand %p1214_p1, %p1174_p0  ;;  %p1223_p8 = por %p1222_p7, %p1221_p4 }
  0x3c   : > { %p1217_p3 = pneg %p1216_p2 }
  0x3e   : > { %p1224_p11 = pnand %p1223_p8, %p1217_p3 }
  0x40   : > { %1227 = shalt.err (!%p1224_p11)
}
  0x41   : > { %1108 = dma.hbm_to_vmem [thread:$0]  (!%p1432_p12), %s1793_s2, 512, %s1436_s15, [#allocation7], %s1302_s16, %s1302_s16, %s1303_s22  }
  0x42   : > { %p1820_p13 = scmp.ne.s32.totalorder %s1818_s29, 0 }
  0x43   : > { %p1821_p5 = scmp.eq.s32.totalorder (!%p1820_p13), %s1396_s21, 0 }
  0x44   : > { %367 = sbr.rel (%p1820_p13) target bundleno = 1764 (0x6e4), region = 64 }
  0x4b   : > { %1273 = dma.done.wait (%p1821_p5), [#allocation4], 2304   ;;  %p1822_p0 = pmov %p1821_p5 }
  0x4d   : > { %1275 = vsyncadd (%p1822_p0), [#allocation4], 4294964992  ;;  %p1823_p6 = pmov %p1822_p0 }
  0x4e   : > { %p1824_p9 = pmov %p1822_p0 }
  0x4f   : > { %1277 = dma.done.wait (%p1823_p6), [#allocation7], 512  }
  0x50   : > { %1279 = vsyncadd (%p1824_p9), [#allocation7], 4294966784  ;;  %s1042_s28 = sshll.u32 %s1396_s21, 1  ;;  %v1304_v6 = vmov 0   ;;  %v428_v15 = vld [vmem:[%s1794_s3] sm:$0xff]  ;;  %s1305_s25 = smov 17   ;;  %v469_v30 = vlaneseq }
  0x51   : > { %p412_p10 = scmp.lt.s32.totalorder %s1042_s28, 3  ;;  %1164 = vset.pattern.permute.xlu1 %v1304_v6  ;;  %1165 = vset.pattern.permute.xlu0 %v1304_v6  ;;  %v429_v18 = vld [vmem:[%s1795_s4] sm:$0xff]  ;;  %s1306_s30 = smov 16   ;;  %v1313_v29 = vmov 0.0   ;;  %v1551_v38 = vld [vmem:[#allocation3 + $0x10] sm:$0xff]  ;;  %v1553_v39 = vld [vmem:[#allocation3 + $0x8] sm:$0xff] }
  0x52   : > { %s1307_s14 = smov 1   ;;  %s1308_s12 = smov 127   ;;  %663 = vmatprep.mubr.f32.mxu0 %v1313_v29  ;;  %894 = vmatprep.mubr.f32.mxu1 %v1313_v29  ;;  %v1541_v32 = vand.u32 127, %v469_v30  ;;  %v1544_v35 = vld [vmem:[#allocation3] sm:$0xff]  ;;  %v1555_v40 = vld [vmem:[#allocation3 + $0x18] sm:$0xff]  ;;  %v1569_v55 = vld [vmem:[#allocation3 + $0x28] sm:$0xff] }
  0x53   : > { %s1835_s28 = smov (!%p412_p10, %s1042_s28), 3  ;;  %s1309_s17 = smov 15   ;;  %v1566_v54 = vld [vmem:[#allocation3 + $0x20] sm:$0xff]  ;;  %v1575_v58 = vld [vmem:[#allocation3 + $0x30] sm:$0xff]  ;;  %v1577_v59 = vld [vmem:[#allocation3 + $0x38] sm:$0xff]  ;;  %vm595_vm8 = vcmask 719872  }
  0x54   : > { %s1043_s13 = sshll.u32 %s1835_s28, 3  ;;  %s1310_s23 = smov 113   ;;  %vm471_vm0 = vcmp.lt.s32.totalorder %v1541_v32, 17  ;;  %vm484_vm1 = vcmp.lt.s32.totalorder %v1541_v32, 16  ;;  %vm497_vm2 = vcmp.lt.s32.totalorder %v1541_v32, 15  ;;  %vm510_vm3 = vcmp.lt.s32.totalorder %v1541_v32, 1 }
  0x55   : > { %s415_s16 = scalar_lea.vmem %s1791_s0, %s1043_s13  ;;  %s1311_s28 = smov 112   ;;  %vm525_vm4 = vcmp.lt.s32.totalorder %v1541_v32, 127  ;;  %vm538_vm5 = vcmp.lt.s32.totalorder %v1541_v32, 113  ;;  %vm551_vm6 = vcmp.lt.s32.totalorder %v1541_v32, 112  ;;  %vm564_vm7 = vcmp.lt.s32.totalorder %v1541_v32, 111  ;;  %v1623_v30 = vld [vmem:[#allocation3 + $0x80] sm:$0xff] }
  0x56   : > { %v426_v0 = vld [vmem:[%s415_s16] sm:$0xff]  ;;  %v427_v1 = vld [vmem:[%s415_s16 + $0x8] sm:$0xff]  ;;  %s1312_s13 = smov 111   ;;  %p1825_p1 = scmp.ne.s32.totalorder %s1815_s27, 0 }
  0x57   : > { %v430_v2 = vadd.f32 %v427_v1, %v426_v0  ;;  %v433_v3 = vmul.f32 %v426_v0, %v426_v0  ;;  %v434_v4 = vmul.f32 %v427_v1, %v427_v1  ;;  %s1314_s24 = smov [#allocation8]  }
  0x59   : > { %431 = vadd.xlane.f32.xlu0 %v430_v2  ;;  %v435_v5 = vadd.f32 %v434_v4, %v433_v3  ;;  %v1588_v3 = vld [vmem:[#allocation3 + $0x50] sm:$0xff]  ;;  %v1590_v4 = vld [vmem:[#allocation3 + $0x58] sm:$0xff] }
  0x5d   : > { %436 = vadd.xlane.f32.xlu0 %v435_v5 }
  0xe6   : > { %v432_v7 = vpop.xlane.xlu0 %431 }
  0xe7   : > { %v438_v8 = vmul.f32 0.00390625, %v432_v7 }
  0xe9   : > { %v440_v10 = vmul.f32 %v438_v8, %v438_v8 }
  0xea   : > { %v437_v9 = vpop.xlane.xlu0 %436 }
  0xeb   : > { %v439_v11 = vmul.f32 0.00390625, %v437_v9 }
  0xed   : > { %v441_v12 = vsub.f32 %v439_v11, %v440_v10 }
  0xef   : > { %v442_v13 = vmax.f32 %v441_v12, 0.0 }
  0xf1   : > { %v443_v14 = vadd.f32 1e-05, %v442_v13 }
  0xf3   : > { %1166 = vrsqrt.f32 %v443_v14 }
  0xfd   : > { %v1167_v16 = vpop.eup %1166 }
  0xfe   : > { %v445_v17 = vmul.f32 %v1167_v16, %v428_v15 }
 0x100   : > { %450 = vperm.xlu1 %1164, %v445_v17   ;;  %v446_v19 = vmul.f32 %v445_v17, %v438_v8  ;;  %v1601_v17 = vld [vmem:[#allocation3 + $0x60] sm:$0xff] }
 0x102   : > { %v447_v20 = vsub.f32 %v429_v18, %v446_v19  ;;  %v1604_v18 = vld [vmem:[#allocation3 + $0x68] sm:$0xff] }
 0x104   : > { %457 = vperm.xlu1 %1164, %v447_v20  }
 0x17f   : > { %v451_v21 = vpop.permute.xlu1 %450 }
 0x180   : > { %v453_v22 = vmul.f32 %v451_v21, %v426_v0  ;;  %v454_v23 = vmul.f32 %v451_v21, %v427_v1  ;;  %v1610_v21 = vld [vmem:[#allocation3 + $0x70] sm:$0xff] }
 0x183   : > { %v458_v24 = vpop.permute.xlu1 %457 }
 0x184   : > { %v460_v25 = vadd.f32 %v458_v24, %v453_v22  ;;  %v461_v26 = vadd.f32 %v458_v24, %v454_v23  ;;  %v1612_v22 = vld [vmem:[#allocation3 + $0x78] sm:$0xff] }
 0x186   : > { %v1505_v27 = vmax.f32 %v460_v25, 0.0  ;;  %v1507_v28 = vmax.f32 %v461_v26, 0.0 }
 0x188   : > { %467 = vrot.lane.b32.xlu1 %v1507_v28, %s1305_s25  ;;  %465 = vrot.lane.b32.xlu0 %v1505_v27, %s1305_s25 }
 0x18c   : > { %480 = vrot.lane.b32.xlu1 %v1505_v27, %s1306_s30  ;;  %508 = vrot.lane.b32.xlu0 %v1507_v28, %s1307_s14 }
 0x190   : > { %482 = vrot.lane.b32.xlu1 %v1507_v28, %s1306_s30  ;;  %523 = vrot.lane.b32.xlu0 %v1507_v28, %s1308_s12 }
 0x194   : > { %493 = vrot.lane.b32.xlu1 %v1505_v27, %s1309_s17  ;;  %536 = vrot.lane.b32.xlu0 %v1507_v28, %s1310_s23 }
 0x198   : > { %495 = vrot.lane.b32.xlu1 %v1507_v28, %s1309_s17  ;;  %549 = vrot.lane.b32.xlu0 %v1507_v28, %s1311_s28 }
 0x19c   : > { %506 = vrot.lane.b32.xlu1 %v1505_v27, %s1307_s14  ;;  %562 = vrot.lane.b32.xlu0 %v1507_v28, %s1312_s13 }
 0x1a0   : > { %521 = vrot.lane.b32.xlu1 %v1505_v27, %s1308_s12 }
 0x1a4   : > { %534 = vrot.lane.b32.xlu1 %v1505_v27, %s1310_s23 }
 0x1a8   : > { %547 = vrot.lane.b32.xlu1 %v1505_v27, %s1311_s28 }
 0x1ac   : > { %560 = vrot.lane.b32.xlu1 %v1505_v27, %s1312_s13 }
 0x1fa   : > { %v468_v31 = vpop.permute.xlu1 %467  ;;  %v466_v33 = vpop.permute.xlu0 %465 }
 0x1fb   : > { %v472_v36 = vsel %vm471_vm0, %v466_v33, %v468_v31  ;;  %v473_v37 = vsel %vm471_vm0, %v468_v31, %v466_v33  ;;  %v1625_v31 = vld [vmem:[#allocation3 + $0x88] sm:$0xff] }
 0x1fc   : > { %v476_v44 = vmul.f32 %v1544_v35, %v473_v37  ;;  %v477_v46 = vmul.f32 %v1553_v39, %v472_v36 }
 0x1fe   : > { %v481_v34 = vpop.permute.xlu1 %480  ;;  %v509_v48 = vpop.permute.xlu0 %508 }
 0x202   : > { %v483_v41 = vpop.permute.xlu1 %482  ;;  %v524_v53 = vpop.permute.xlu0 %523 }
 0x203   : > { %v485_v42 = vsel %vm484_vm1, %v481_v34, %v483_v41  ;;  %v486_v43 = vsel %vm484_vm1, %v483_v41, %v481_v34 }
 0x204   : > { %v489_v45 = vmul.f32 %v1551_v38, %v486_v43  ;;  %v490_v47 = vmul.f32 %v1555_v40, %v485_v42  ;;  %v1631_v43 = vld [vmem:[#allocation6 + $0x8] sm:$0xff] }
 0x206   : > { %v494_v49 = vpop.permute.xlu1 %493  ;;  %v1052_v50 = vpack.c.bf16 %v490_v47, %v477_v46  ;;  %v1054_v51 = vpack.c.bf16 %v489_v45, %v476_v44  ;;  %v537_v5 = vpop.permute.xlu0 %536  ;;  %v1633_v44 = vld [vmem:[#allocation6] sm:$0xff] }
 0x208   : > { %1053 = vmatprep.subr.bf16.mxu0 %v1052_v50  ;;  %v1642_v50 = vld [vmem:[#allocation6 + $0x10] sm:$0xff] }
 0x209   : > { %1055 = vmatpush1.bf16.msra.mxu0 %v1054_v51  ;;  %v464_v51 = vld [vmem:[%s1796_s5] sm:$0xff] }
 0x20a   : > { %v496_v52 = vpop.permute.xlu1 %495  ;;  %v550_v16 = vpop.permute.xlu0 %549 }
 0x20b   : > { %v498_v56 = vsel %vm497_vm2, %v494_v49, %v496_v52  ;;  %v499_v57 = vsel %vm497_vm2, %v496_v52, %v494_v49  ;;  %v1639_v49 = vld [vmem:[#allocation6 + $0x18] sm:$0xff] }
 0x20c   : > { %v502_v63 = vmul.f32 %v1566_v54, %v499_v57  ;;  %v503_v0 = vmul.f32 %v1569_v55, %v498_v56 }
 0x20e   : > { %v507_v60 = vpop.permute.xlu1 %506  ;;  %v563_v33 = vpop.permute.xlu0 %562 }
 0x20f   : > { %v511_v61 = vsel %vm510_vm3, %v507_v60, %v509_v48  ;;  %v512_v62 = vsel %vm510_vm3, %v509_v48, %v507_v60 }
 0x210   : > { %v515_v1 = vmul.f32 %v1575_v58, %v512_v62  ;;  %v516_v2 = vmul.f32 %v1577_v59, %v511_v61 }
 0x212   : > { %v522_v6 = vpop.permute.xlu1 %521  ;;  %v1056_v7 = vpack.c.bf16 %v516_v2, %v503_v0  ;;  %v1058_v8 = vpack.c.bf16 %v515_v1, %v502_v63 }
 0x213   : > { %v526_v9 = vsel %vm525_vm4, %v522_v6, %v524_v53  ;;  %v527_v10 = vsel %vm525_vm4, %v524_v53, %v522_v6 }
 0x214   : > { %v530_v11 = vmul.f32 %v1588_v3, %v526_v9  ;;  %v531_v12 = vmul.f32 %v1590_v4, %v527_v10  ;;  %1057 = vmatprep.subr.bf16.mxu0 %v1056_v7 }
 0x215   : > { %1059 = vmatpush1.bf16.msra.mxu0 %v1058_v8  ;;  %v670_v8 = vld [vmem:[%s1797_s6] sm:$0xff] }
 0x216   : > { %v535_v13 = vpop.permute.xlu1 %534  ;;  %v1060_v14 = vpack.c.bf16 %v531_v12, %v1507_v28  ;;  %v1062_v15 = vpack.c.bf16 %v530_v11, %v1505_v27  ;;  %v671_v11 = vld [vmem:[%s1798_s7] sm:$0xff] }
 0x217   : > { %v539_v19 = vsel %vm538_vm5, %v535_v13, %v537_v5  ;;  %v540_v20 = vsel %vm538_vm5, %v537_v5, %v535_v13 }
 0x218   : > { %1061 = vmatprep.subr.bf16.mxu0 %v1060_v14  ;;  %v543_v26 = vmul.f32 %v1601_v17, %v539_v19  ;;  %v544_v27 = vmul.f32 %v1604_v18, %v540_v20 }
 0x219   : > { %1063 = vmatpush1.bf16.msra.mxu0 %v1062_v15 }
 0x21a   : > { %v548_v23 = vpop.permute.xlu1 %547 }
 0x21b   : > { %v552_v24 = vsel %vm551_vm6, %v548_v23, %v550_v16  ;;  %v553_v25 = vsel %vm551_vm6, %v550_v16, %v548_v23 }
 0x21c   : > { %v556_v28 = vmul.f32 %v1610_v21, %v552_v24  ;;  %v557_v29 = vmul.f32 %v1612_v22, %v553_v25 }
 0x21e   : > { %v561_v34 = vpop.permute.xlu1 %560  ;;  %v1064_v36 = vpack.c.bf16 %v557_v29, %v544_v27  ;;  %v1066_v37 = vpack.c.bf16 %v556_v28, %v543_v26 }
 0x21f   : > { %v565_v41 = vsel %vm564_vm7, %v561_v34, %v563_v33  ;;  %v566_v42 = vsel %vm564_vm7, %v563_v33, %v561_v34 }
 0x220   : > { %v569_v45 = vmul.f32 %v1623_v30, %v565_v41  ;;  %v570_v46 = vmul.f32 %v1625_v31, %v566_v42  ;;  %1065 = vmatprep.subr.bf16.mxu0 %v1064_v36 }
 0x221   : > { %1067 = vmatpush1.bf16.msra.mxu0 %v1066_v37 }
 0x222   : > { %v1068_v47 = vpack.c.bf16 %v1631_v43, %v570_v46  ;;  %v1070_v48 = vpack.c.bf16 %v1633_v44, %v569_v45 }
 0x224   : > { %1069 = vmatprep.subr.bf16.mxu0 %v1068_v47 }
 0x225   : > { %1071 = vmatpush1.bf16.msra.mxu0 %v1070_v48 }
 0x226   : > { %619 = vmatprep.subr.mxu0 %v1639_v49 }
 0x229   : > { %620 = vmatpush1.msra.mxu0 %v1642_v50 }
 0x22a   : > { %1044 = vmatmul.mubr.msk.f32.vlgmr.msra.gmra.mrb[0].mxu0 %vm595_vm8, %v464_v51 }
 0x2fd   : > { %v665_v52 = vpop.f32.mrb[0].mxu0 }
 0x2fe   : > { %v667_v53 = vpop.f32.mrb[1].mxu0  ;;  %v675_v56 = vmul.f32 %v665_v52, %v665_v52 }
 0x2ff   : > { %v676_v57 = vmul.f32 %v667_v53, %v667_v53  ;;  %v672_v60 = vadd.f32 %v667_v53, %v665_v52 }
 0x301   : > { %673 = vadd.xlane.f32.xlu1 %v672_v60  ;;  %v677_v61 = vadd.f32 %v676_v57, %v675_v56 }
 0x303   : > { %678 = vadd.xlane.f32.xlu0 %v677_v61 }
 0x38e   : > { %v674_v62 = vpop.xlane.xlu1 %673 }
 0x38f   : > { %v680_v63 = vmul.f32 0.00390625, %v674_v62 }
 0x390   : > { %v679_v0 = vpop.xlane.xlu0 %678 }
 0x391   : > { %v682_v1 = vmul.f32 %v680_v63, %v680_v63  ;;  %v681_v2 = vmul.f32 0.00390625, %v679_v0 }
 0x393   : > { %v683_v5 = vsub.f32 %v681_v2, %v682_v1 }
 0x395   : > { %v684_v6 = vmax.f32 %v683_v5, 0.0 }
 0x397   : > { %v685_v7 = vadd.f32 1e-05, %v684_v6 }
 0x399   : > { %1168 = vrsqrt.f32 %v685_v7 }
 0x3a3   : > { %v1169_v9 = vpop.eup %1168 }
 0x3a4   : > { %v687_v10 = vmul.f32 %v1169_v9, %v670_v8 }
 0x3a6   : > { %692 = vperm.xlu0 %1165, %v687_v10   ;;  %v688_v12 = vmul.f32 %v687_v10, %v680_v63 }
 0x3a8   : > { %v689_v13 = vsub.f32 %v671_v11, %v688_v12 }
 0x3aa   : > { %699 = vperm.xlu1 %1164, %v689_v13  }
 0x425   : > { %v693_v14 = vpop.permute.xlu0 %692 }
 0x426   : > { %v695_v15 = vmul.f32 %v693_v14, %v665_v52  ;;  %v696_v19 = vmul.f32 %v693_v14, %v667_v53 }
 0x429   : > { %v700_v16 = vpop.permute.xlu1 %699 }
 0x42a   : > { %v702_v20 = vadd.f32 %v700_v16, %v695_v15  ;;  %v703_v23 = vadd.f32 %v700_v16, %v696_v19 }
 0x42c   : > { %v1655_v24 = vmax.f32 %v702_v20, 0.0  ;;  %v705_v25 = vmax.f32 %v703_v23, 0.0 }
 0x42e   : > { %743 = vrot.lane.b32.xlu0 %v1655_v24, %s1307_s14  ;;  %707 = vrot.lane.b32.xlu1 %v1655_v24, %s1305_s25 }
 0x432   : > { %757 = vrot.lane.b32.xlu0 %v1655_v24, %s1308_s12  ;;  %709 = vrot.lane.b32.xlu1 %v705_v25, %s1305_s25  ;;  %s1232_s25 = sshll.u32 %s1314_s24, 4  ;;  %s1233_s25 = int_to_ptr.vmem [resolvable:$false] %s1232_s25 }
 0x436   : > { %769 = vrot.lane.b32.xlu0 %v1655_v24, %s1310_s23  ;;  %719 = vrot.lane.b32.xlu1 %v1655_v24, %s1306_s30 }
 0x43a   : > { %781 = vrot.lane.b32.xlu0 %v1655_v24, %s1311_s28  ;;  %721 = vrot.lane.b32.xlu1 %v705_v25, %s1306_s30  ;;  %s1234_s30 = scalar_lea.vmem %s1233_s25, 512 }
 0x43e   : > { %793 = vrot.lane.b32.xlu0 %v1655_v24, %s1312_s13  ;;  %731 = vrot.lane.b32.xlu1 %v1655_v24, %s1309_s17 }
 0x442   : > { %733 = vrot.lane.b32.xlu1 %v705_v25, %s1309_s17 }
 0x446   : > { %745 = vrot.lane.b32.xlu1 %v705_v25, %s1307_s14 }
 0x44a   : > { %759 = vrot.lane.b32.xlu1 %v705_v25, %s1308_s12 }
 0x44e   : > { %771 = vrot.lane.b32.xlu1 %v705_v25, %s1310_s23  ;;  %s408_s23 = sand.u32 1, %s1290_s18  }
 0x452   : > { %783 = vrot.lane.b32.xlu1 %v705_v25, %s1311_s28  ;;  %s1041_s28 = sshll.u32 %s408_s23, 4 }
 0x453   : > { %s410_s15 = scalar_lea.vmem [#allocation8], %s1041_s28 }
 0x454   : > { %s952_s29 = sshll.u32 %s410_s15, 4  ;;  %s1751_s29 = int_to_ptr.vmem [resolvable:$true] %s952_s29 }
 0x455   : > { %s1228_s26 = scalar_lea.vmem %s1751_s29, 256  ;;  %p1235_p4 = scmp.lt.s32.totalorder %s1751_s29, %s1233_s25 }
 0x456   : > { %795 = vrot.lane.b32.xlu1 %v705_v25, %s1312_s13  ;;  %s1051_s13 = sshll.u32 %s1396_s21, 8  ;;  %s938_s21 = scalar_lea.sflag [#allocation5], %s408_s23 }
 0x457   : > { %s1749_s19 = scalar_lea.hbm %s1802_s11, %s1051_s13  ;;  %p1229_p12 = scmp.ne.s32.totalorder %s1751_s29, %s1228_s26 }
 0x458   : > { %p1236_p7 = scmp.lt.s32.totalorder %s1234_s30, %s1228_s26 }
 0x459   : > { %p1230_p2 = pnand %p1229_p12, %p1825_p1 }
 0x45a   : > { %p1237_p8 = por %p1236_p7, %p1235_p4 }
 0x45b   : > { %p1231_p3 = pneg %p1230_p2 }
 0x45d   : > { %p1238_p11 = pnand %p1237_p8, %p1231_p3 }
 0x4a0   : > { %v708_v26 = vpop.permute.xlu1 %707  ;;  %v744_v47 = vpop.permute.xlu0 %743 }
 0x4a4   : > { %v710_v27 = vpop.permute.xlu1 %709  ;;  %v758_v56 = vpop.permute.xlu0 %757 }
 0x4a5   : > { %v711_v29 = vsel %vm471_vm0, %v708_v26, %v710_v27  ;;  %v712_v33 = vsel %vm471_vm0, %v710_v27, %v708_v26 }
 0x4a6   : > { %v715_v41 = vmul.f32 %v712_v33, %v1544_v35  ;;  %v716_v45 = vmul.f32 %v711_v29, %v1553_v39 }
 0x4a8   : > { %v720_v28 = vpop.permute.xlu1 %719  ;;  %v770_v0 = vpop.permute.xlu0 %769 }
 0x4ac   : > { %v722_v34 = vpop.permute.xlu1 %721  ;;  %v782_v9 = vpop.permute.xlu0 %781 }
 0x4ad   : > { %v723_v36 = vsel %vm484_vm1, %v720_v28, %v722_v34  ;;  %v724_v37 = vsel %vm484_vm1, %v722_v34, %v720_v28 }
 0x4ae   : > { %v727_v42 = vmul.f32 %v724_v37, %v1551_v38  ;;  %v728_v46 = vmul.f32 %v723_v36, %v1555_v40 }
 0x4b0   : > { %v732_v48 = vpop.permute.xlu1 %731  ;;  %v1072_v51 = vpack.c.bf16 %v728_v46, %v716_v45  ;;  %v1074_v52 = vpack.c.bf16 %v727_v42, %v715_v41  ;;  %v794_v19 = vpop.permute.xlu0 %793  ;;  %v901_v42 = vld [vmem:[%s1800_s9] sm:$0xff] }
 0x4b2   : > { %1073 = vmatprep.subr.bf16.mxu1 %v1072_v51 }
 0x4b3   : > { %1075 = vmatpush1.bf16.msra.mxu1 %v1074_v52 }
 0x4b4   : > { %v734_v53 = vpop.permute.xlu1 %733 }
 0x4b5   : > { %v735_v57 = vsel %vm497_vm2, %v732_v48, %v734_v53  ;;  %v736_v35 = vsel %vm497_vm2, %v734_v53, %v732_v48 }
 0x4b6   : > { %v739_v40 = vmul.f32 %v736_v35, %v1566_v54  ;;  %v740_v61 = vmul.f32 %v735_v57, %v1569_v55 }
 0x4b8   : > { %v746_v60 = vpop.permute.xlu1 %745 }
 0x4b9   : > { %v747_v38 = vsel %vm510_vm3, %v744_v47, %v746_v60  ;;  %v748_v39 = vsel %vm510_vm3, %v746_v60, %v744_v47  ;;  %v902_v47 = vld [vmem:[%s1801_s10] sm:$0xff] }
 0x4ba   : > { %v751_v62 = vmul.f32 %v748_v39, %v1575_v58  ;;  %v752_v63 = vmul.f32 %v747_v38, %v1577_v59 }
 0x4bc   : > { %v760_v1 = vpop.permute.xlu1 %759  ;;  %v1076_v2 = vpack.c.bf16 %v752_v63, %v740_v61  ;;  %v1078_v5 = vpack.c.bf16 %v751_v62, %v739_v40 }
 0x4bd   : > { %v761_v6 = vsel %vm525_vm4, %v758_v56, %v760_v1  ;;  %v762_v7 = vsel %vm525_vm4, %v760_v1, %v758_v56 }
 0x4be   : > { %v765_v8 = vmul.f32 %v761_v6, %v1588_v3  ;;  %v766_v54 = vmul.f32 %v762_v7, %v1590_v4  ;;  %1077 = vmatprep.subr.bf16.mxu1 %v1076_v2 }
 0x4bf   : > { %1079 = vmatpush1.bf16.msra.mxu1 %v1078_v5 }
 0x4c0   : > { %v772_v55 = vpop.permute.xlu1 %771  ;;  %v1080_v58 = vpack.c.bf16 %v766_v54, %v705_v25  ;;  %v1082_v59 = vpack.c.bf16 %v765_v8, %v1655_v24 }
 0x4c1   : > { %v773_v10 = vsel %vm538_vm5, %v770_v0, %v772_v55  ;;  %v774_v11 = vsel %vm538_vm5, %v772_v55, %v770_v0 }
 0x4c2   : > { %1081 = vmatprep.subr.bf16.mxu1 %v1080_v58  ;;  %v777_v13 = vmul.f32 %v773_v10, %v1601_v17  ;;  %v778_v14 = vmul.f32 %v774_v11, %v1604_v18 }
 0x4c3   : > { %1083 = vmatpush1.bf16.msra.mxu1 %v1082_v59 }
 0x4c4   : > { %v784_v12 = vpop.permute.xlu1 %783 }
 0x4c5   : > { %v785_v3 = vsel %vm551_vm6, %v782_v9, %v784_v12  ;;  %v786_v4 = vsel %vm551_vm6, %v784_v12, %v782_v9 }
 0x4c6   : > { %v789_v15 = vmul.f32 %v785_v3, %v1610_v21  ;;  %v790_v16 = vmul.f32 %v786_v4, %v1612_v22  ;;  %v706_v22 = vld [vmem:[%s1799_s8] sm:$0xff] }
 0x4c8   : > { %v796_v20 = vpop.permute.xlu1 %795  ;;  %v1084_v23 = vpack.c.bf16 %v790_v16, %v778_v14  ;;  %v1086_v24 = vpack.c.bf16 %v789_v15, %v777_v13 }
 0x4c9   : > { %v797_v25 = vsel %vm564_vm7, %v794_v19, %v796_v20  ;;  %v798_v26 = vsel %vm564_vm7, %v796_v20, %v794_v19 }
 0x4ca   : > { %v801_v27 = vmul.f32 %v797_v25, %v1623_v30  ;;  %v802_v17 = vmul.f32 %v798_v26, %v1625_v31  ;;  %1085 = vmatprep.subr.bf16.mxu1 %v1084_v23 }
 0x4cb   : > { %1087 = vmatpush1.bf16.msra.mxu1 %v1086_v24 }
 0x4cc   : > { %v1088_v18 = vpack.c.bf16 %v1631_v43, %v802_v17  ;;  %v1090_v21 = vpack.c.bf16 %v1633_v44, %v801_v27 }
 0x4ce   : > { %1089 = vmatprep.subr.bf16.mxu1 %v1088_v18 }
 0x4cf   : > { %1091 = vmatpush1.bf16.msra.mxu1 %v1090_v21 }
 0x4d0   : > { %850 = vmatprep.subr.mxu1 %v1639_v49 }
 0x4d3   : > { %851 = vmatpush1.msra.mxu1 %v1642_v50 }
 0x4d4   : > { %1045 = vmatmul.mubr.msk.f32.vlgmr.msra.gmra.mrb[0].mxu1 %vm595_vm8, %v706_v22 }
 0x5a7   : > { %v896_v32 = vpop.f32.mrb[0].mxu1 }
 0x5a8   : > { %v898_v30 = vpop.f32.mrb[1].mxu1  ;;  %v906_v31 = vmul.f32 %v896_v32, %v896_v32 }
 0x5a9   : > { %v907_v28 = vmul.f32 %v898_v30, %v898_v30  ;;  %v903_v29 = vadd.f32 %v898_v30, %v896_v32 }
 0x5ab   : > { %904 = vadd.xlane.f32.xlu0 %v903_v29  ;;  %v908_v43 = vadd.f32 %v907_v28, %v906_v31 }
 0x5ad   : > { %909 = vadd.xlane.f32.xlu1 %v908_v43 }
 0x638   : > { %v905_v44 = vpop.xlane.xlu0 %904 }
 0x639   : > { %v911_v33 = vmul.f32 0.00390625, %v905_v44 }
 0x63a   : > { %v910_v49 = vpop.xlane.xlu1 %909 }
 0x63b   : > { %v913_v34 = vmul.f32 %v911_v33, %v911_v33  ;;  %v912_v36 = vmul.f32 0.00390625, %v910_v49 }
 0x63d   : > { %v914_v37 = vsub.f32 %v912_v36, %v913_v34 }
 0x63f   : > { %v915_v41 = vmax.f32 %v914_v37, 0.0 }
 0x641   : > { %v916_v50 = vadd.f32 1e-05, %v915_v41 }
 0x643   : > { %1170 = vrsqrt.f32 %v916_v50 }
 0x64d   : > { %v1171_v45 = vpop.eup %1170 }
 0x64e   : > { %v918_v46 = vmul.f32 %v1171_v45, %v901_v42 }
 0x650   : > { %923 = vperm.xlu0 %1165, %v918_v46   ;;  %v919_v48 = vmul.f32 %v918_v46, %v911_v33 }
 0x652   : > { %v920_v51 = vsub.f32 %v902_v47, %v919_v48 }
 0x654   : > { %930 = vperm.xlu1 %1164, %v920_v51  }
 0x6cf   : > { %v924_v52 = vpop.permute.xlu0 %923 }
 0x6d0   : > { %v926_v53 = vmul.f32 %v924_v52, %v896_v32  ;;  %v927_v56 = vmul.f32 %v924_v52, %v898_v30 }
 0x6d3   : > { %v931_v57 = vpop.permute.xlu1 %930 }
 0x6d4   : > { %v933_v35 = vadd.f32 %v931_v57, %v926_v53  ;;  %v934_v60 = vadd.f32 %v931_v57, %v927_v56 }
 0x6d6   : > { %935 = vst [vmem:[%s410_s15] sm:$0xff] %v933_v35  ;;  %936 = vst [vmem:[%s410_s15 + $0x8] sm:$0xff] %v934_v60 }
 0x6d7   : > { %1241 = shalt.err (!%p1238_p11)
}
 0x6d8   : > { %s1242_s14 = scalar_lea.hbm %s1749_s19, 256  ;;  %s1246_s23 = scalar_lea.hbm %s1802_s11, 512 }
 0x6d9   : > { %p1243_p13 = scmp.ne.s32.totalorder %s1749_s19, %s1242_s14  ;;  %p1247_p6 = scmp.lt.u32.totalorder %s1749_s19, %s1802_s11 }
 0x6da   : > { %p1248_p9 = scmp.lt.u32.totalorder %s1246_s23, %s1242_s14  ;;  %p1250_p12 = scmp.lt.u32.totalorder %s1242_s14, %s1749_s19 }
 0x6db   : > { %p1244_p5 = pnand %p1243_p13, %p1825_p1 }
 0x6dc   : > { %p1249_p10 = por %p1248_p9, %p1247_p6 }
 0x6dd   : > { %p1245_p0 = pneg %p1244_p5 }
 0x6de   : > { %p1251_p2 = por %p1250_p12, %p1249_p10 }
 0x6e0   : > { %p1252_p3 = pnand %p1251_p2, %p1245_p0 }
 0x6e2   : > { %1255 = shalt.err (!%p1252_p3)
}
 0x6e3   : > { %1100 = dma.vmem_to_hbm [thread:$0]  (%p1825_p1), %s1751_s29, 256, %s1749_s19, %s938_s21  }
 0x6e4 PF: > { %s1826_s15 = sld [smem:[#allocation12_spill]]  ;;  %s1827_s16 = sld [smem:[#allocation16_spill]] }
 0x6e5   : > { %p1117_p4 = scmp.ge.s32.totalorder %s1298_s20, 2 }
 0x6ea   : > { %s964_s22 = sand.u32 1, %s1826_s15   ;;  %p1828_p7 = scmp.ne.s32.totalorder %s1827_s16, 0 }
 0x6eb   : > { %s965_s26 = scalar_lea.sflag [#allocation5], %s964_s22 }
 0x6ec   : > { %p1110_p8 = pnand %p1117_p4, %p1828_p7 }
 0x6ee   : > { %1281 = dma.done.wait (!%p1110_p8), %s965_s26, 256  }
 0x6ef   : > { %1283 = vsyncadd (!%p1110_p8), %s965_s26, 4294967040  ;;  %s1829_s20 = sld [smem:[#allocation14_spill]]  ;;  %s1830_s24 = sld [smem:[#allocation13_spill]] }
 0x6f0   : > { %s1831_s19 = sld [smem:[#allocation15_spill]]  ;;  %s1832_s17 = smov %s1290_s18 }
 0x6f5   : > { %p23_p11 = scmp.ge.s32.totalorder %s1829_s20, 4   ;;  %s1833_s18 = smov %s1830_s24 }
 0x6f7   :  { %25 = sbr.rel (!%p23_p11) target bundleno = 5 (0x5), region = 108 }
 0x6fe   :  { %970 = vsyncpa [#allocation4], 1 }
 0x6ff   :  { %972 = vsyncpa [#allocation4 + $0x1], 1 }
 0x700   :  { %973 = vsyncpa [#allocation7], 1 }
 0x701   :  { %974 = vsyncpa [#allocation5], 1 }
 0x702   :  { %976 = vsyncpa [#allocation5 + $0x1], 1 }

</bundles_post_ra>
